<compile_context>
chip_gen: v5e
topology: v5e:2x2
jax: 0.10.0
libtpu: 0.0.40
codegen_flags: <defaults>
</compile_context>

<pallas_src>
import math

import jax
import jax.numpy as jnp
from jax.experimental import pallas as pl
from jax.experimental.pallas import tpu as pltpu


# Left zero-pad width inside the per-tile halo slab.  8 keeps the DMA
# destination sublane-aligned; column _LP-1 is the conv's left zero border.
_LP = 8


def _round_up(x, m):
    return (x + m - 1) // m * m


# ----------------------------------------------------------------------------
# Kernel 1: tiled 3x3 / stride-1 / pad-1 conv + ReLU (+ optional fused
#           residual add).  Grid: (batch, row-tile, cout-tile).
# ----------------------------------------------------------------------------
def _make_conv_kernel(fuse_residual, ch_rows):
    def kernel(x_hbm, w_ref, b_ref, *rest):
        if fuse_residual:
            res_ref, o_ref, xs_ref, sh_ref, sem = rest
        else:
            o_ref, xs_ref, sh_ref, sem = rest

        bi = pl.program_id(0)
        hi = pl.program_id(1)
        ci = pl.program_id(2)
        n_h = pl.num_programs(1)

        TH = o_ref.shape[1]          # output row tile
        W = o_ref.shape[2]           # image width
        TCO = o_ref.shape[3]         # cout tile
        W2 = xs_ref.shape[1]         # padded slab width (multiple of 8)
        CI = xs_ref.shape[2]

        # ------------------------------------------------------------------
        # Fetch the halo slab once per (batch, row-tile); reuse across ci.
        # Slab row s, col c  <->  input row hi*TH + s - 1, col c - _LP.
        # ------------------------------------------------------------------
        @pl.when(ci == 0)
        def _fetch():
            r0 = hi * TH

            # Start every DMA before doing any other work.
            body = pltpu.make_async_copy(
                x_hbm.at[bi, pl.ds(r0, TH)],
                xs_ref.at[pl.ds(1, TH), pl.ds(_LP, W)],
                sem.at[0])
            body.start()

            @pl.when(hi > 0)
            def _():
                pltpu.make_async_copy(
                    x_hbm.at[bi, pl.ds(r0 - 1, 1)],
                    xs_ref.at[pl.ds(0, 1), pl.ds(_LP, W)],
                    sem.at[1]).start()

            @pl.when(hi < n_h - 1)
            def _():
                pltpu.make_async_copy(
                    x_hbm.at[bi, pl.ds(r0 + TH, 1)],
                    xs_ref.at[pl.ds(TH + 1, 1), pl.ds(_LP, W)],
                    sem.at[2]).start()

            # Border-only zero fill (regions are disjoint from the DMA
            # destinations), done while the copies are in flight.
            xs_ref[:, 0:_LP, :] = jnp.zeros((TH + 3, _LP, CI), xs_ref.dtype)
            xs_ref[:, _LP + W:W2, :] = jnp.zeros(
                (TH + 3, W2 - _LP - W, CI), xs_ref.dtype)
            xs_ref[TH + 2, :, :] = jnp.zeros((W2, CI), xs_ref.dtype)

            @pl.when(hi == 0)
            def _():
                xs_ref[0, pl.ds(_LP, W), :] = jnp.zeros((W, CI), xs_ref.dtype)

            @pl.when(hi == n_h - 1)
            def _():
                xs_ref[TH + 1, pl.ds(_LP, W), :] = jnp.zeros((W, CI),
                                                             xs_ref.dtype)

            # Wait for the halo rows and then the body.
            @pl.when(hi > 0)
            def _():
                pltpu.make_async_copy(
                    x_hbm.at[bi, pl.ds(r0 - 1, 1)],
                    xs_ref.at[pl.ds(0, 1), pl.ds(_LP, W)],
                    sem.at[1]).wait()

            @pl.when(hi < n_h - 1)
            def _():
                pltpu.make_async_copy(
                    x_hbm.at[bi, pl.ds(r0 + TH, 1)],
                    xs_ref.at[pl.ds(TH + 1, 1), pl.ds(_LP, W)],
                    sem.at[2]).wait()

            body.wait()

            # Hoisted dx-shifted operands: built once per (batch, row-tile)
            # and reused for every cout tile.  Only dx != 1 costs a sublane
            # relayout, paid once here instead of once per cout tile.
            flat = xs_ref[...].reshape((TH + 3) * W2, CI)
            for dx in range(3):
                start = _LP - 1 + dx
                sh_ref[:, dx * CI:(dx + 1) * CI] = (
                    flat[start:start + (TH + 2) * W2, :])

        # ------------------------------------------------------------------
        # 3 MXU dots with K = 3*CI (the 9 taps folded along dx).  Partial sums
        # stay in vregs / the MXU result buffer; one store per row-chunk — no
        # per-tap VMEM read-modify-write of an accumulator.
        # ------------------------------------------------------------------
        w_dy = [w_ref[dy, ci] for dy in range(3)]     # (3*CI, TCO) each
        bias = b_ref[ci].astype(jnp.float32)          # (1, TCO)

        for r0 in range(0, TH, ch_rows):
            ch = min(ch_rows, TH - r0)
            acc = None
            for dy in range(3):
                p = sh_ref[pl.ds((dy + r0) * W2, ch * W2), :]
                d = jnp.dot(p, w_dy[dy], preferred_element_type=jnp.float32)
                acc = d if acc is None else acc + d
            out = jnp.maximum(acc + bias, 0.0)          # bias + ReLU (f32)
            out = out.reshape(ch, W2, TCO)[:, :W, :]    # drop pad columns
            if fuse_residual:
                out = out + res_ref[0, pl.ds(r0, ch)]   # x2mid + x_input_final
            o_ref[0, pl.ds(r0, ch)] = out.astype(o_ref.dtype)

    return kernel


def conv3x3_relu(x_nhwc, w_hwio, b, *, residual=None, out_dtype=jnp.bfloat16):
    """3x3, stride 1, pad 1 conv + ReLU (+ optional fused residual add).

    x: (B, H, W, Cin)  (bf16 recommended)
    w: (3, 3, Cin, Cout) HWIO, b: (Cout,)
    residual (optional): (B, H, W, Cout) f32, added after the ReLU.
    """
    B, H, W, CI = x_nhwc.shape
    CO = w_hwio.shape[-1]

    if CO % 256 == 0:
        TCO = 256              # fills the 256-wide MXU on v6e/v7x
    elif CO % 128 == 0:
        TCO = 128
    else:
        TCO = CO
    NCO = CO // TCO
    W2 = _round_up(W + _LP + 1, 8)            # slab width

    lane = lambda c: max(_round_up(c, 128), 128)
    x_bytes = jnp.dtype(x_nhwc.dtype).itemsize
    out_bytes = jnp.dtype(out_dtype).itemsize

    def accounted(th):
        slab = (th + 3) * W2 * lane(CI) * x_bytes
        shifted = (th + 2) * W2 * lane(3 * CI) * x_bytes
        weights = 2 * 3 * NCO * (3 * CI) * lane(TCO) * x_bytes   # double-buffered
        outb = 2 * th * W * lane(TCO) * out_bytes
        resb = 2 * th * W * lane(TCO) * 4 if residual is not None else 0
        return slab + shifted + weights + outb + resb

    # Largest divisor of H whose resident footprint fits a v7x-safe budget
    # (64 MiB physical VMEM, leave headroom for temporaries / Mosaic scratch).
    budget = 34 << 20
    TH = 1
    for d in range(H, 0, -1):
        if H % d == 0 and accounted(d) <= budget:
            TH = d
            break

    # Row chunk so each f32 partial sum stays a small (<= ~2 MiB) temporary.
    ch_rows = max(1, min(TH, (2 << 20) // max(1, W2 * lane(TCO) * 4)))

    est = accounted(TH)
    vmem_limit = int(min(max(est * 3 // 2 + (12 << 20), 32 << 20), 52 << 20))

    # (dy, dx, ci, co) -> (dy, cout_tile, dx*CI + ci, co_in_tile): dx is folded
    # into the contraction (K = 3*CI); the cout tile is a leading index so the
    # full weight stays VMEM-resident (constant block index => fetched from
    # HBM once per layer, not once per grid step).
    w_k = w_hwio.reshape(3, 3 * CI, NCO, TCO).transpose(0, 2, 1, 3)
    b_k = b.reshape(NCO, 1, TCO).astype(jnp.float32)

    in_specs = [
        pl.BlockSpec(memory_space=pl.ANY),                                     # x (manual halo DMA)
        pl.BlockSpec((3, NCO, 3 * CI, TCO), lambda bb, hh, cc: (0, 0, 0, 0)),  # weights (resident)
        pl.BlockSpec((NCO, 1, TCO), lambda bb, hh, cc: (0, 0, 0)),             # bias (resident)
    ]
    args = [x_nhwc, w_k, b_k]
    if residual is not None:
        in_specs.append(
            pl.BlockSpec((1, TH, W, TCO), lambda bb, hh, cc: (bb, hh, 0, cc)))
        args.append(residual)

    return pl.pallas_call(
        _make_conv_kernel(residual is not None, ch_rows),
        out_shape=jax.ShapeDtypeStruct((B, H, W, CO), out_dtype),
        grid_spec=pltpu.PrefetchScalarGridSpec(
            num_scalar_prefetch=0,
            grid=(B, H // TH, NCO),
            in_specs=in_specs,
            out_specs=pl.BlockSpec((1, TH, W, TCO),
                                   lambda bb, hh, cc: (bb, hh, 0, cc)),
            scratch_shapes=[
                pltpu.VMEM((TH + 3, W2, CI), x_nhwc.dtype),           # halo slab
                pltpu.VMEM(((TH + 2) * W2, 3 * CI), x_nhwc.dtype),    # shifted concat
                pltpu.SemaphoreType.DMA((3,)),                        # body/top/bottom
            ],
        ),
        compiler_params=pltpu.CompilerParams(
            # batch / row-tile are independent -> megacore-shardable; the cout
            # axis must stay sequential (slab + shifted operands are built at
            # ci == 0 and reused for ci > 0).
            dimension_semantics=("parallel", "parallel", "arbitrary"),
            vmem_limit_bytes=vmem_limit,
        ),
    )(*args)


# ----------------------------------------------------------------------------
# Kernel 2: attn = where(attn < mean(attn), 0, 1)   (global mean, as in
#           torch.where(attn < float(attn.mean()), 0., 255.) / 255).
# ----------------------------------------------------------------------------
def _attn_threshold_kernel(a_ref, o_ref):
    a = a_ref[...]
    m = jnp.sum(a) / a.size
    o_ref[...] = jnp.where(a < m, 0.0, 1.0)


def attn_threshold(attn_2d):
    return pl.pallas_call(
        _attn_threshold_kernel,
        out_shape=jax.ShapeDtypeStruct(attn_2d.shape, jnp.float32),
    )(attn_2d)


# ----------------------------------------------------------------------------
# Parameter init (deterministic, PyTorch-conv-default-like uniform).
# ----------------------------------------------------------------------------
_CONV_CHANNELS = [(3, 64), (64, 128), (128, 512), (512, 512), (512, 128), (128, 3)]


def init_params(key):
    params = []
    for (cin, cout) in _CONV_CHANNELS:
        key, kw, kb = jax.random.split(key, 3)
        bound = 1.0 / math.sqrt(cin * 3 * 3)
        w = jax.random.uniform(kw, (3, 3, cin, cout), jnp.float32, -bound, bound)
        b = jax.random.uniform(kb, (cout,), jnp.float32, -bound, bound)
        params.append((w, b))
    return params


# ----------------------------------------------------------------------------
# Forward wrapper (glue in plain JAX; hot paths in the Pallas kernels above).
# ----------------------------------------------------------------------------
def model2_forward(params, x_nchw, attn):
    B, C, H, W = x_nchw.shape
    # TODO(synk): kornia gaussian_blur2d + morphology.dilation on attn skipped.
    attn_bin = attn_threshold(attn.reshape(B, H * W).astype(jnp.float32))
    attn_bin = attn_bin.reshape(B, 1, H, W)

    # TODO(synk): warp()/grid_sample, cv2 contour split and torchvision resizes
    # skipped; the conv stack consumes the input frames directly.
    x_input_final = jnp.transpose(x_nchw, (0, 2, 3, 1)).astype(jnp.float32)   # NHWC f32

    # conv stack runs in bf16 (MXU-friendly, halves HBM traffic on the big
    # intermediates); accumulation / bias / ReLU stay f32 inside the kernel.
    h = x_input_final.astype(jnp.bfloat16)
    n_layers = len(params)
    for li, (w, b) in enumerate(params):
        last = li == n_layers - 1
        h = conv3x3_relu(
            h,
            w.astype(jnp.bfloat16),
            b.astype(jnp.float32),
            # TODO(synk): TwoHeadsNetwork1 between conv5 and the residual is
            # undefined in the source; the residual `x2mid + x_input_final`
            # is fused directly into conv5's epilogue (after its ReLU, as in
            # the reference once TwoHeadsNetwork1 is skipped).
            residual=x_input_final if last else None,
            out_dtype=jnp.float32 if last else jnp.bfloat16,
        )

    return jnp.transpose(h, (0, 3, 1, 2)), attn_bin   # back to NCHW


if __name__ == "__main__":
    key = jax.random.PRNGKey(0)
    kx, ka = jax.random.split(key)
    # group_size = 5 frames, RGB, small spatial (module uses 224; kept small).
    B, C, H, W = 5, 3, 16, 16
    x = jax.random.normal(kx, (B, C, H, W), jnp.float32)
    attn = jax.random.uniform(ka, (B, H, W), jnp.float32)

    params = init_params(jax.random.PRNGKey(42))

    x2mid, attn_bin = model2_forward(params, x, attn)
    jax.block_until_ready((x2mid, attn_bin))

    assert x2mid.shape == (B, C, H, W)
    assert attn_bin.shape == (B, 1, H, W)
    print("KERNEL_OK")
</pallas_src>

<mosaic_0001>
module attributes {stable_mosaic.version = 11 : i64} {
  func.func @_attn_threshold_kernel(%arg0: memref<5x256xf32, #tpu.memory_space<vmem>>, %arg1: memref<5x256xf32, #tpu.memory_space<vmem>>) attributes {dimension_semantics = [], scalar_prefetch = 0 : i64, scratch_operands = 0 : i64, tpu.core_type = #tpu.core_type<tc>} {
    %c0 = arith.constant 0 : index
    %c0_0 = arith.constant 0 : index
    %0 = vector.load %arg0[%c0, %c0_0] : memref<5x256xf32, #tpu.memory_space<vmem>>, vector<5x256xf32>
    %1 = vector.shape_cast %0 : vector<5x256xf32> to vector<1x5x256xf32>
    %cst = arith.constant dense<0.000000e+00> : vector<1xf32>
    %2 = vector.multi_reduction <add>, %1, %cst [1, 2] : vector<1x5x256xf32> to vector<1xf32>
    %3 = vector.shape_cast %2 : vector<1xf32> to vector<1x1x1xf32>
    %4 = vector.extract %3[0, 0, 0] : f32 from vector<1x1x1xf32>
    %cst_1 = arith.constant 1.280000e+03 : f32
    %5 = arith.divf %4, %cst_1 : f32
    %6 = vector.broadcast %5 : f32 to vector<5x256xf32>
    %7 = arith.cmpf olt, %0, %6 : vector<5x256xf32>
    %cst_2 = arith.constant 0.000000e+00 : f32
    %cst_3 = arith.constant 1.000000e+00 : f32
    %8 = vector.broadcast %cst_2 : f32 to vector<5x256xf32>
    %9 = vector.broadcast %cst_3 : f32 to vector<5x256xf32>
    %10 = arith.select %7, %8, %9 : vector<5x256xi1>, vector<5x256xf32>
    %c0_4 = arith.constant 0 : index
    %c0_5 = arith.constant 0 : index
    %11 = vector.load %arg1[%c0_4, %c0_5] : memref<5x256xf32, #tpu.memory_space<vmem>>, vector<5x256xf32>
    tpu.vector_store %arg1[%c0_4, %c0_5], %10 {strides = array<i32>} : memref<5x256xf32, #tpu.memory_space<vmem>>, vector<5x256xf32>,
    return
  }
}

</mosaic_0001>

<bundles_post_ra>
// kernel: tpu_custom_call.1
= control target key start
LH: loop header
LB: loop body
LE: loop exit
PB: predicated region body
PF: predicated region fallthrough
CT: control target
= control target key end

     0   :  { %6 = vsyncpa [#allocation3], 0  ;;  %s153_s0 = inlined_call_operand.hbm [shape: f32[5,256], index: 0, kind: input, shape index: {}]   ;;  %s154_s1 = inlined_call_operand.hbm [shape: f32[5,256], index: 1, kind: output, shape index: {}]  }
   0x1   :  { %7 = vsyncpa [#allocation4], 0  ;;  %s13_s8 = sshll.u32 %s153_s0, 4  ;;  %s133_s9 = smov [#allocation2]   ;;  %s14_s8 = int_to_ptr.hbm [resolvable:$true] %s13_s8 }
   0x2   :  { %s15_s10 = sshll.u32 %s133_s9, 4  ;;  %s16_s10 = int_to_ptr.vmem [resolvable:$true] %s15_s10 }
   0x3   :  { %18 = dma.hbm_to_vmem [thread:$0]  %s14_s8, 256, %s16_s10, [#allocation3]  }
   0x4   :  { %129 = dma.done.wait [#allocation3], 256  }
   0x5   :  { %130 = vsyncadd [#allocation3], 4294967040  ;;  %vm25_vm0 = vcmask 1044480   ;;  %v23_v0 = vld [vmem:[#allocation2] sm:$0x1f]  ;;  %v134_v5 = vmov 1280.0  }
   0x6   :  { %v24_v1 = vld [vmem:[#allocation2 + $0x8] sm:$0x1f]  ;;  %v26_v2 = vsel %vm25_vm0, %v23_v0, 0.0  ;;  %79 = vrcp.f32 %v134_v5  ;;  %s135_s13 = smov [#allocation5]   ;;  %s61_s17 = sshll.u32 %s154_s1, 4  ;;  %v136_v20 = vmov 1.0   ;;  %s62_s17 = int_to_ptr.hbm [resolvable:$true] %s61_s17 }
   0x7   :  { %v27_v3 = vsel %vm25_vm0, %v24_v1, 0.0  ;;  %s59_s14 = sshll.u32 %s135_s13, 4  ;;  %s60_s14 = int_to_ptr.vmem [resolvable:$true] %s59_s14 }
   0x8   :  { %v28_v4 = vadd.f32 %v27_v3, %v26_v2 }
   0xa   :  { %29 = vadd.xlane.f32.xlu0 %v28_v4 }
   0xc   :  { %v80_v6 = vpop.eup %79 }
   0xd   :  { %v39_v7 = vmul.f32 1280.0, %v80_v6  ;;  %vm43_vm1 = vweird.f32 %v80_v6 }
   0xf   :  { %v40_v8 = vsub.f32 1.0, %v39_v7 }
  0x11   :  { %v41_v12 = vmul.f32 %v80_v6, %v40_v8 }
  0x13   :  { %v42_v15 = vadd.f32 %v80_v6, %v41_v12 }
  0x15   :  { %v44_v18 = vsel %vm43_vm1, %v80_v6, %v42_v15 }
  0x7d   :  { %v30_v9 = vpop.xlane.xlu0 %29 }
  0x7e   :  { %v31_v10 = vrot.slane %v30_v9, 4 }
  0x80   :  { %v32_v11 = vadd.f32 %v31_v10, %v30_v9 }
  0x82   :  { %v33_v13 = vrot.slane %v32_v11, 2 }
  0x84   :  { %v34_v14 = vadd.f32 %v33_v13, %v32_v11 }
  0x86   :  { %v35_v16 = vrot.slane %v34_v14, 1 }
  0x88   :  { %v36_v17 = vadd.f32 %v35_v16, %v34_v14 }
  0x8a   :  { %71 = vpush %v36_v17 }
  0x8b   :  { %73 = vpush %v44_v18 }
  0xbb   :  { %s72_s0 = spop %71 }
  0xbc   :  { %s74_s11 = spop %73 }
  0xbd   :  { %s46_s12 = smul.f32 %s74_s11, %s72_s0 }
  0xbf   :  { %v47_v19 = vstv %s46_s12 }
  0xc0   :  { %vm48_vm2 = vcmp.lt.f32.partialorder %v23_v0, %v47_v19  ;;  %vm49_vm3 = vcmp.lt.f32.partialorder %v24_v1, %v47_v19 }
  0xc1   :  { %v50_v21 = vsel %vm48_vm2, 0.0, %v136_v20  ;;  %v51_v22 = vsel %vm49_vm3, 0.0, %v136_v20 }
  0xc2   :  { %52 = vst [vmem:[#allocation5] sm:$0x1f] %v50_v21 }
  0xc3   :  { %53 = vst [vmem:[#allocation5 + $0x8] sm:$0x1f] %v51_v22 }
  0xc4   :  { %64 = dma.vmem_to_hbm [thread:$0]  %s60_s14, 256, %s62_s17, [#allocation4]  }
  0xc5   :  { %131 = dma.done.wait [#allocation4], 256  }
  0xc6   :  { %132 = vsyncadd [#allocation4], 4294967040 }
  0xc7   :  { %69 = vsyncpa [#allocation3], 1 }
  0xc8   :  { %70 = vsyncpa [#allocation4], 1 }

</bundles_post_ra>
